<compile_context>
chip_gen: v6e
topology: v6e:2x2x1
jax: 0.10.0
libtpu: 0.0.40
codegen_flags: <defaults>
</compile_context>

<pallas_src>
import functools

import jax
import jax.numpy as jnp
from jax.experimental import pallas as pl
from jax.experimental.pallas import tpu as pltpu

LEAKY_SLOPE = 0.2
BN_EPS = 1e-5
LANE = 128
MAX_K_TILE = 512


def _round_up(n, m):
    return ((n + m - 1) // m) * m


def _act_bn(h, pkd_ref, inv_batch):
    """LeakyReLU(0.2) + training-mode BatchNorm1d, all in f32.

    pkd_ref is (3, out): rows = [bias, gamma, beta]. Pad lanes carry
    bias = gamma = beta = 0, so padded features remain exactly zero.
    """
    b = pkd_ref[0:1, :]
    gamma = pkd_ref[1:2, :]
    beta = pkd_ref[2:3, :]
    h = h + b
    h = jnp.maximum(h, LEAKY_SLOPE * h)                 # exact for slope < 1
    mu = jnp.sum(h, axis=0, keepdims=True) * inv_batch
    c = h - mu                                          # centered, two-pass var
    var = jnp.sum(c * c, axis=0, keepdims=True) * inv_batch
    scale = gamma * jax.lax.rsqrt(var + BN_EPS)         # EUP slot
    return c * scale + beta                             # wide tensor: 1 mul + 1 add


def _encoder_kernel(n_hidden, inv_batch, *refs):
    """Ref layout:
      inputs : x(bf16, K-streamed), W0(bf16, K-streamed), packed0(3,out0),
               [W_i (HBM/ANY, bf16), packed_i] for i=1..n_hidden-1,
               W_head (HBM/ANY, bf16), b_head (1, head_w),
      outputs: head_out (batch, head_w) f32,
      scratch: acc (batch, out0) f32,
               W_i VMEM buffers, W_head VMEM buffer,
               DMA semaphores (n_hidden,)
    """
    n_manual = n_hidden                       # W_1..W_{n-1} plus the fused head
    x_ref, w0_ref, pkd0_ref = refs[0], refs[1], refs[2]
    idx = 3
    w_hbm, pkd = [], [pkd0_ref]
    for _ in range(n_hidden - 1):
        w_hbm.append(refs[idx])
        pkd.append(refs[idx + 1])
        idx += 2
    w_head_hbm = refs[idx]
    b_head_ref = refs[idx + 1]
    idx += 2
    out_ref = refs[idx]
    acc_ref = refs[idx + 1]
    idx += 2
    w_vmem = []
    for _ in range(n_hidden - 1):
        w_vmem.append(refs[idx])
        idx += 1
    w_head_vmem = refs[idx]
    sem = refs[idx + 1]

    k = pl.program_id(0)

    @pl.when(k == 0)
    def _init():
        acc_ref[...] = jnp.zeros_like(acc_ref)
        # Kick off HBM->VMEM copies of every later-layer weight so they
        # overlap the streamed layer-0 matmul below.
        for j in range(n_hidden - 1):
            pltpu.make_async_copy(w_hbm[j], w_vmem[j], sem.at[j]).start()
        pltpu.make_async_copy(w_head_hbm, w_head_vmem, sem.at[n_manual - 1]).start()

    # Layer-0 partial product for this K chunk (bf16 operands, f32 accumulate).
    acc_ref[...] += jnp.dot(x_ref[...], w0_ref[...],
                            preferred_element_type=jnp.float32)

    @pl.when(k == pl.num_programs(0) - 1)
    def _finish():
        h = _act_bn(acc_ref[...], pkd[0], inv_batch)
        for j in range(n_hidden - 1):
            pltpu.make_async_copy(w_hbm[j], w_vmem[j], sem.at[j]).wait()
            h = jnp.dot(h.astype(jnp.bfloat16), w_vmem[j][...],
                        preferred_element_type=jnp.float32)
            h = _act_bn(h, pkd[j + 1], inv_batch)
        pltpu.make_async_copy(w_head_hbm, w_head_vmem, sem.at[n_manual - 1]).wait()
        # Fused mean/log_var head: one MXU push, one lane-dense store.
        out_ref[...] = jnp.dot(h.astype(jnp.bfloat16), w_head_vmem[...],
                               preferred_element_type=jnp.float32) + b_head_ref[...]


def encoder_forward(x, params, latent_dim):
    """params: dict with
       'hidden': list of (W, b, gamma, beta); W is (in, out)
       'mean':   (W, b)   W is (hidden_last, latent)
       'var':    (W, b)
    Returns (mean, log_var), each (batch, latent_dim) float32.
    """
    n_hidden = len(params["hidden"])
    batch, input_dim = x.shape
    f32, bf16 = jnp.float32, jnp.bfloat16

    # ---- lane-padded sizes --------------------------------------------------
    tk = min(MAX_K_TILE, _round_up(input_dim, LANE))
    in0_pad = _round_up(input_dim, tk)
    out_pads = [_round_up(w.shape[1], LANE) for (w, _, _, _) in params["hidden"]]
    hm_pad = _round_up(latent_dim, LANE)     # mean head, lane aligned
    hv_pad = _round_up(latent_dim, LANE)     # var head, lane aligned
    head_w = hm_pad + hv_pad

    def pack_bgb(b, g, be, out_pad):
        pad = out_pad - b.shape[0]
        # pad lanes: bias = gamma = beta = 0 -> padded features stay exactly 0
        return jnp.stack([jnp.pad(b.astype(f32), (0, pad)),
                          jnp.pad(g.astype(f32), (0, pad)),
                          jnp.pad(be.astype(f32), (0, pad))], axis=0)

    # ---- layer 0: input + weight streamed over K ----------------------------
    x_pad = jnp.pad(x.astype(f32), ((0, 0), (0, in0_pad - input_dim))).astype(bf16)
    w0, b0, g0, be0 = params["hidden"][0]
    w0_pad = jnp.pad(w0.astype(f32),
                     ((0, in0_pad - w0.shape[0]),
                      (0, out_pads[0] - w0.shape[1]))).astype(bf16)

    flat_inputs = [x_pad, w0_pad, pack_bgb(b0, g0, be0, out_pads[0])]
    in_specs = [
        pl.BlockSpec((batch, tk), lambda k: (0, k)),        # x: K-streamed
        pl.BlockSpec((tk, out_pads[0]), lambda k: (k, 0)),  # W0: K-streamed
        pl.BlockSpec((3, out_pads[0]), lambda k: (0, 0)),   # resident
    ]
    scratch = [pltpu.VMEM((batch, out_pads[0]), f32)]       # layer-0 accumulator

    # ---- later hidden layers: weights stay in HBM, manually prefetched ------
    manual_vmem = []
    for i in range(1, n_hidden):
        w, b, g, be = params["hidden"][i]
        w_pad = jnp.pad(w.astype(f32),
                        ((0, out_pads[i - 1] - w.shape[0]),
                         (0, out_pads[i] - w.shape[1]))).astype(bf16)
        flat_inputs += [w_pad, pack_bgb(b, g, be, out_pads[i])]
        in_specs += [pl.BlockSpec(memory_space=pl.ANY),
                     pl.BlockSpec((3, out_pads[i]), lambda k: (0, 0))]
        manual_vmem.append(pltpu.VMEM((out_pads[i - 1], out_pads[i]), bf16))

    # ---- fused, per-head lane-padded mean/var projection ---------------------
    wm, bm = params["mean"]
    wv, bv = params["var"]
    h_last = wm.shape[0]
    wm_pad = jnp.pad(wm.astype(f32), ((0, out_pads[-1] - h_last),
                                      (0, hm_pad - latent_dim)))
    wv_pad = jnp.pad(wv.astype(f32), ((0, out_pads[-1] - h_last),
                                      (0, hv_pad - latent_dim)))
    w_head = jnp.concatenate([wm_pad, wv_pad], axis=1).astype(bf16)
    b_head = jnp.concatenate(
        [jnp.pad(bm.astype(f32), (0, hm_pad - latent_dim)),
         jnp.pad(bv.astype(f32), (0, hv_pad - latent_dim))]).reshape(1, head_w)
    flat_inputs += [w_head, b_head]
    in_specs += [pl.BlockSpec(memory_space=pl.ANY),
                 pl.BlockSpec((1, head_w), lambda k: (0, 0))]
    manual_vmem.append(pltpu.VMEM((out_pads[-1], head_w), bf16))

    scratch += manual_vmem
    scratch.append(pltpu.SemaphoreType.DMA((n_hidden,)))    # one sem per manual DMA

    # ---- VMEM budget & cost hint ---------------------------------------------
    vmem_bytes = 0
    vmem_bytes += 2 * (batch * tk + tk * out_pads[0]) * 2        # streamed bf16 blocks (x2 bufs)
    vmem_bytes += 2 * sum(3 * p * 4 for p in out_pads)           # packed bias/gamma/beta
    vmem_bytes += 2 * head_w * 4                                 # b_head
    vmem_bytes += 2 * batch * head_w * 4                         # output block
    vmem_bytes += batch * out_pads[0] * 4                        # accumulator scratch
    vmem_bytes += sum(out_pads[i - 1] * out_pads[i] for i in range(1, n_hidden)) * 2
    vmem_bytes += out_pads[-1] * head_w * 2
    vmem_limit = int(min(max(2 * vmem_bytes, 16 << 20), 64 << 20))

    flops = 2 * batch * (in0_pad * out_pads[0]
                         + sum(out_pads[i - 1] * out_pads[i] for i in range(1, n_hidden))
                         + out_pads[-1] * head_w)
    bytes_accessed = int(sum(int(a.size) * a.dtype.itemsize for a in flat_inputs)
                         + batch * head_w * 4)
    cost = pl.CostEstimate(flops=int(flops),
                           transcendentals=int(sum(out_pads)),
                           bytes_accessed=bytes_accessed)

    kernel = functools.partial(_encoder_kernel, n_hidden, float(1.0 / batch))

    head_out = pl.pallas_call(
        kernel,
        out_shape=jax.ShapeDtypeStruct((batch, head_w), jnp.float32),
        grid_spec=pltpu.PrefetchScalarGridSpec(
            num_scalar_prefetch=0,
            grid=(in0_pad // tk,),
            in_specs=in_specs,
            out_specs=pl.BlockSpec((batch, head_w), lambda k: (0, 0)),
            scratch_shapes=scratch),
        compiler_params=pltpu.CompilerParams(
            dimension_semantics=("arbitrary",),          # K is a reduction axis
            vmem_limit_bytes=vmem_limit),
        cost_estimate=cost,
    )(*flat_inputs)

    mean = head_out[:, :latent_dim]
    log_var = head_out[:, hm_pad:hm_pad + latent_dim]    # lane-aligned slice start
    return mean, log_var


# ------------------------------------------------------------------------------
# Deterministic parameter init (mirrors nn.Linear + xavier_uniform_ + BN init).
# ------------------------------------------------------------------------------
def xavier_uniform(key, fan_in, fan_out):
    limit = jnp.sqrt(6.0 / (fan_in + fan_out))
    # stored as (in, out) == PyTorch weight.T
    return jax.random.uniform(key, (fan_in, fan_out), jnp.float32, -limit, limit)


def linear_bias(key, fan_in, fan_out):
    bound = 1.0 / jnp.sqrt(fan_in)
    return jax.random.uniform(key, (fan_out,), jnp.float32, -bound, bound)


def init_encoder_params(key, input_dim, hidden_dims, latent_dim):
    params = {"hidden": []}
    dims = [input_dim] + list(hidden_dims)
    for i in range(len(hidden_dims)):
        key, kw, kb = jax.random.split(key, 3)
        w = xavier_uniform(kw, dims[i], dims[i + 1])
        b = linear_bias(kb, dims[i], dims[i + 1])
        gamma = jnp.ones((dims[i + 1],), jnp.float32)    # BN weight init
        beta = jnp.zeros((dims[i + 1],), jnp.float32)    # BN bias init
        params["hidden"].append((w, b, gamma, beta))
    key, kwm, kbm, kwv, kbv = jax.random.split(key, 5)
    params["mean"] = (xavier_uniform(kwm, hidden_dims[-1], latent_dim),
                      linear_bias(kbm, hidden_dims[-1], latent_dim))
    params["var"] = (xavier_uniform(kwv, hidden_dims[-1], latent_dim),
                     linear_bias(kbv, hidden_dims[-1], latent_dim))
    return params


# ------------------------------------------------------------------------------
# Pure-JAX f32 reference (same math as the PyTorch module) for correctness.
# ------------------------------------------------------------------------------
def encoder_reference(x, params):
    h = x.astype(jnp.float32)
    for (w, b, g, be) in params["hidden"]:
        h = h @ w + b
        h = jnp.where(h > 0, h, LEAKY_SLOPE * h)
        mu = jnp.mean(h, axis=0, keepdims=True)
        var = jnp.mean((h - mu) ** 2, axis=0, keepdims=True)
        h = (h - mu) / jnp.sqrt(var + BN_EPS) * g + be
    wm, bm = params["mean"]
    wv, bv = params["var"]
    return h @ wm + bm, h @ wv + bv


if __name__ == "__main__":
    batch = 8
    input_dim = 32
    hidden_dims = (64, 32)
    latent_dim = 16

    key = jax.random.PRNGKey(0)
    key, kx, kp = jax.random.split(key, 3)
    x = jax.random.normal(kx, (batch, input_dim), jnp.float32)
    params = init_encoder_params(kp, input_dim, hidden_dims, latent_dim)

    mean, log_var = encoder_forward(x, params, latent_dim)
    jax.block_until_ready((mean, log_var))

    ref_mean, ref_log_var = encoder_reference(x, params)
    assert mean.shape == ref_mean.shape and log_var.shape == ref_log_var.shape
    # bf16 matmul operands -> tolerance loosened vs the f32 reference.
    assert jnp.allclose(mean, ref_mean, atol=5e-2, rtol=5e-2)
    assert jnp.allclose(log_var, ref_log_var, atol=5e-2, rtol=5e-2)

    print("KERNEL_OK")
</pallas_src>

<mosaic_0001>
module attributes {stable_mosaic.version = 11 : i64} {
  func.func @_encoder_kernel(%arg0: i32, %arg1: memref<8x128xbf16, #tpu.memory_space<vmem>>, %arg2: memref<128x128xbf16, #tpu.memory_space<vmem>>, %arg3: memref<3x128xf32, #tpu.memory_space<vmem>>, %arg4: memref<128x128xbf16, #tpu.memory_space<any>>, %arg5: memref<3x128xf32, #tpu.memory_space<vmem>>, %arg6: memref<128x256xbf16, #tpu.memory_space<any>>, %arg7: memref<1x256xf32, #tpu.memory_space<vmem>>, %arg8: memref<8x256xf32, #tpu.memory_space<vmem>>, %arg9: memref<8x128xf32, #tpu.memory_space<vmem>>, %arg10: memref<128x128xbf16, #tpu.memory_space<vmem>>, %arg11: memref<128x256xbf16, #tpu.memory_space<vmem>>, %arg12: memref<2x!tpu.dma_semaphore, #tpu.memory_space<semaphore_mem>>) attributes {dimension_semantics = [#tpu.dimension_semantics<arbitrary>], iteration_bounds = array<i64: 1>, scalar_prefetch = 0 : i64, scratch_operands = 4 : i64, tpu.core_type = #tpu.core_type<tc>, window_params = [{transform_indices = @transform_0, window_bounds = array<i64: 8, 128>}, {transform_indices = @transform_1, window_bounds = array<i64: 128, 128>}, {pipeline_mode = #tpu.pipeline_mode<synchronous>, transform_indices = @transform_2, window_bounds = array<i64: 3, 128>}, {}, {pipeline_mode = #tpu.pipeline_mode<synchronous>, transform_indices = @transform_4, window_bounds = array<i64: 3, 128>}, {}, {pipeline_mode = #tpu.pipeline_mode<synchronous>, transform_indices = @transform_6, window_bounds = array<i64: 1, 256>}, {pipeline_mode = #tpu.pipeline_mode<synchronous>, transform_indices = @transform_7, window_bounds = array<i64: 8, 256>}]} {
    %c0_i32 = arith.constant 0 : i32
    %0 = arith.cmpi eq, %arg0, %c0_i32 : i32
    %1 = arith.extui %0 : i1 to i32
    %c0_i32_0 = arith.constant 0 : i32
    %2 = arith.cmpi ne, %1, %c0_i32_0 : i32
    scf.if %2 {
      %cst_10 = arith.constant 0.000000e+00 : f32
      %12 = vector.broadcast %cst_10 : f32 to vector<8x128xf32>
      %c0_11 = arith.constant 0 : index
      %c0_12 = arith.constant 0 : index
      %13 = vector.load %arg9[%c0_11, %c0_12] : memref<8x128xf32, #tpu.memory_space<vmem>>, vector<8x128xf32>
      tpu.vector_store %arg9[%c0_11, %c0_12], %12 {strides = array<i32>} : memref<8x128xf32, #tpu.memory_space<vmem>>, vector<8x128xf32>,
      %c0_i32_13 = arith.constant 0 : i32
      %14 = tpu.memref_slice %arg12[%c0_i32_13] : memref<2x!tpu.dma_semaphore, #tpu.memory_space<semaphore_mem>> -> memref<1x!tpu.dma_semaphore, #tpu.memory_space<semaphore_mem>>
      %15 = tpu.memref_squeeze %14 : memref<1x!tpu.dma_semaphore, #tpu.memory_space<semaphore_mem>> -> memref<!tpu.dma_semaphore, #tpu.memory_space<semaphore_mem>>
      tpu.enqueue_dma source(%arg4 : memref<128x128xbf16, #tpu.memory_space<any>>) target(%arg10 : memref<128x128xbf16, #tpu.memory_space<vmem>>) target_semaphore(%15 : memref<!tpu.dma_semaphore, #tpu.memory_space<semaphore_mem>>)
      %c1_i32 = arith.constant 1 : i32
      %16 = tpu.memref_slice %arg12[%c1_i32] : memref<2x!tpu.dma_semaphore, #tpu.memory_space<semaphore_mem>> -> memref<1x!tpu.dma_semaphore, #tpu.memory_space<semaphore_mem>>
      %17 = tpu.memref_squeeze %16 : memref<1x!tpu.dma_semaphore, #tpu.memory_space<semaphore_mem>> -> memref<!tpu.dma_semaphore, #tpu.memory_space<semaphore_mem>>
      tpu.enqueue_dma source(%arg6 : memref<128x256xbf16, #tpu.memory_space<any>>) target(%arg11 : memref<128x256xbf16, #tpu.memory_space<vmem>>) target_semaphore(%17 : memref<!tpu.dma_semaphore, #tpu.memory_space<semaphore_mem>>)
    } else {
    }
    %c0 = arith.constant 0 : index
    %c0_1 = arith.constant 0 : index
    %3 = vector.load %arg9[%c0, %c0_1] : memref<8x128xf32, #tpu.memory_space<vmem>>, vector<8x128xf32>
    %c0_2 = arith.constant 0 : index
    %c0_3 = arith.constant 0 : index
    %4 = vector.load %arg1[%c0_2, %c0_3] : memref<8x128xbf16, #tpu.memory_space<vmem>>, vector<8x128xbf16>
    %c0_4 = arith.constant 0 : index
    %c0_5 = arith.constant 0 : index
    %5 = vector.load %arg2[%c0_4, %c0_5] : memref<128x128xbf16, #tpu.memory_space<vmem>>, vector<128x128xbf16>
    %cst = arith.constant dense<0.000000e+00> : vector<8x128xf32>
    %6 = tpu.matmul %4, %5, %cst {dimension_numbers = #tpu.dot_dimension_numbers<[1], [0], [0], [1], [0, 0, 1, 1], [], []>} : vector<8x128xbf16>, vector<128x128xbf16>, vector<8x128xf32> -> vector<8x128xf32>
    %7 = arith.addf %3, %6 : vector<8x128xf32>
    %c0_6 = arith.constant 0 : index
    %c0_7 = arith.constant 0 : index
    %8 = vector.load %arg9[%c0_6, %c0_7] : memref<8x128xf32, #tpu.memory_space<vmem>>, vector<8x128xf32>
    tpu.vector_store %arg9[%c0_6, %c0_7], %7 {strides = array<i32>} : memref<8x128xf32, #tpu.memory_space<vmem>>, vector<8x128xf32>,
    %c0_i32_8 = arith.constant 0 : i32
    %9 = arith.cmpi eq, %arg0, %c0_i32_8 : i32
    %10 = arith.extui %9 : i1 to i32
    %c0_i32_9 = arith.constant 0 : i32
    %11 = arith.cmpi ne, %10, %c0_i32_9 : i32
    scf.if %11 {
      %c0_10 = arith.constant 0 : index
      %c0_11 = arith.constant 0 : index
      %12 = vector.load %arg9[%c0_10, %c0_11] : memref<8x128xf32, #tpu.memory_space<vmem>>, vector<8x128xf32>
      %c0_12 = arith.constant 0 : index
      %c0_13 = arith.constant 0 : index
      %13 = vector.load %arg3[%c0_12, %c0_13] : memref<3x128xf32, #tpu.memory_space<vmem>>, vector<1x128xf32>
      %c1 = arith.constant 1 : index
      %c0_14 = arith.constant 0 : index
      %14 = vector.load %arg3[%c1, %c0_14] : memref<3x128xf32, #tpu.memory_space<vmem>>, vector<1x128xf32>
      %c2 = arith.constant 2 : index
      %c0_15 = arith.constant 0 : index
      %15 = vector.load %arg3[%c2, %c0_15] : memref<3x128xf32, #tpu.memory_space<vmem>>, vector<1x128xf32>
      %16 = vector.broadcast %13 : vector<1x128xf32> to vector<8x128xf32>
      %17 = arith.addf %12, %16 : vector<8x128xf32>
      %cst_16 = arith.constant 2.000000e-01 : f32
      %18 = vector.broadcast %cst_16 : f32 to vector<8x128xf32>
      %19 = arith.mulf %18, %17 : vector<8x128xf32>
      %20 = arith.maximumf %17, %19 : vector<8x128xf32>
      %cst_17 = arith.constant dense<0.000000e+00> : vector<128xf32>
      %21 = vector.multi_reduction <add>, %20, %cst_17 [0] : vector<8x128xf32> to vector<128xf32>
      %22 = vector.shape_cast %21 : vector<128xf32> to vector<1x128xf32>
      %cst_18 = arith.constant 1.250000e-01 : f32
      %23 = vector.broadcast %cst_18 : f32 to vector<1x128xf32>
      %24 = arith.mulf %22, %23 : vector<1x128xf32>
      %25 = vector.broadcast %24 : vector<1x128xf32> to vector<8x128xf32>
      %26 = arith.subf %20, %25 : vector<8x128xf32>
      %27 = arith.mulf %26, %26 : vector<8x128xf32>
      %cst_19 = arith.constant dense<0.000000e+00> : vector<128xf32>
      %28 = vector.multi_reduction <add>, %27, %cst_19 [0] : vector<8x128xf32> to vector<128xf32>
      %29 = vector.shape_cast %28 : vector<128xf32> to vector<1x128xf32>
      %cst_20 = arith.constant 1.250000e-01 : f32
      %30 = vector.broadcast %cst_20 : f32 to vector<1x128xf32>
      %31 = arith.mulf %29, %30 : vector<1x128xf32>
      %cst_21 = arith.constant 9.99999974E-6 : f32
      %32 = vector.broadcast %cst_21 : f32 to vector<1x128xf32>
      %33 = arith.addf %31, %32 : vector<1x128xf32>
      %34 = math.rsqrt %33 : vector<1x128xf32>
      %35 = arith.mulf %14, %34 : vector<1x128xf32>
      %36 = vector.broadcast %35 : vector<1x128xf32> to vector<8x128xf32>
      %37 = arith.mulf %26, %36 : vector<8x128xf32>
      %38 = vector.broadcast %15 : vector<1x128xf32> to vector<8x128xf32>
      %39 = arith.addf %37, %38 : vector<8x128xf32>
      %c0_i32_22 = arith.constant 0 : i32
      %40 = tpu.memref_slice %arg12[%c0_i32_22] : memref<2x!tpu.dma_semaphore, #tpu.memory_space<semaphore_mem>> -> memref<1x!tpu.dma_semaphore, #tpu.memory_space<semaphore_mem>>
      %41 = tpu.memref_squeeze %40 : memref<1x!tpu.dma_semaphore, #tpu.memory_space<semaphore_mem>> -> memref<!tpu.dma_semaphore, #tpu.memory_space<semaphore_mem>>
      tpu.wait_dma2 semaphore(%41 : memref<!tpu.dma_semaphore, #tpu.memory_space<semaphore_mem>>) src(%arg4 : memref<128x128xbf16, #tpu.memory_space<any>>) dst(%arg10 : memref<128x128xbf16, #tpu.memory_space<vmem>>)
      %42 = arith.truncf %39 : vector<8x128xf32> to vector<8x128xbf16>
      %c0_23 = arith.constant 0 : index
      %c0_24 = arith.constant 0 : index
      %43 = vector.load %arg10[%c0_23, %c0_24] : memref<128x128xbf16, #tpu.memory_space<vmem>>, vector<128x128xbf16>
      %cst_25 = arith.constant dense<0.000000e+00> : vector<8x128xf32>
      %44 = tpu.matmul %42, %43, %cst_25 {dimension_numbers = #tpu.dot_dimension_numbers<[1], [0], [0], [1], [0, 0, 1, 1], [], []>} : vector<8x128xbf16>, vector<128x128xbf16>, vector<8x128xf32> -> vector<8x128xf32>
      %c0_26 = arith.constant 0 : index
      %c0_27 = arith.constant 0 : index
      %45 = vector.load %arg5[%c0_26, %c0_27] : memref<3x128xf32, #tpu.memory_space<vmem>>, vector<1x128xf32>
      %c1_28 = arith.constant 1 : index
      %c0_29 = arith.constant 0 : index
      %46 = vector.load %arg5[%c1_28, %c0_29] : memref<3x128xf32, #tpu.memory_space<vmem>>, vector<1x128xf32>
      %c2_30 = arith.constant 2 : index
      %c0_31 = arith.constant 0 : index
      %47 = vector.load %arg5[%c2_30, %c0_31] : memref<3x128xf32, #tpu.memory_space<vmem>>, vector<1x128xf32>
      %48 = vector.broadcast %45 : vector<1x128xf32> to vector<8x128xf32>
      %49 = arith.addf %44, %48 : vector<8x128xf32>
      %cst_32 = arith.constant 2.000000e-01 : f32
      %50 = vector.broadcast %cst_32 : f32 to vector<8x128xf32>
      %51 = arith.mulf %50, %49 : vector<8x128xf32>
      %52 = arith.maximumf %49, %51 : vector<8x128xf32>
      %cst_33 = arith.constant dense<0.000000e+00> : vector<128xf32>
      %53 = vector.multi_reduction <add>, %52, %cst_33 [0] : vector<8x128xf32> to vector<128xf32>
      %54 = vector.shape_cast %53 : vector<128xf32> to vector<1x128xf32>
      %cst_34 = arith.constant 1.250000e-01 : f32
      %55 = vector.broadcast %cst_34 : f32 to vector<1x128xf32>
      %56 = arith.mulf %54, %55 : vector<1x128xf32>
      %57 = vector.broadcast %56 : vector<1x128xf32> to vector<8x128xf32>
      %58 = arith.subf %52, %57 : vector<8x128xf32>
      %59 = arith.mulf %58, %58 : vector<8x128xf32>
      %cst_35 = arith.constant dense<0.000000e+00> : vector<128xf32>
      %60 = vector.multi_reduction <add>, %59, %cst_35 [0] : vector<8x128xf32> to vector<128xf32>
      %61 = vector.shape_cast %60 : vector<128xf32> to vector<1x128xf32>
      %cst_36 = arith.constant 1.250000e-01 : f32
      %62 = vector.broadcast %cst_36 : f32 to vector<1x128xf32>
      %63 = arith.mulf %61, %62 : vector<1x128xf32>
      %cst_37 = arith.constant 9.99999974E-6 : f32
      %64 = vector.broadcast %cst_37 : f32 to vector<1x128xf32>
      %65 = arith.addf %63, %64 : vector<1x128xf32>
      %66 = math.rsqrt %65 : vector<1x128xf32>
      %67 = arith.mulf %46, %66 : vector<1x128xf32>
      %68 = vector.broadcast %67 : vector<1x128xf32> to vector<8x128xf32>
      %69 = arith.mulf %58, %68 : vector<8x128xf32>
      %70 = vector.broadcast %47 : vector<1x128xf32> to vector<8x128xf32>
      %71 = arith.addf %69, %70 : vector<8x128xf32>
      %c1_i32 = arith.constant 1 : i32
      %72 = tpu.memref_slice %arg12[%c1_i32] : memref<2x!tpu.dma_semaphore, #tpu.memory_space<semaphore_mem>> -> memref<1x!tpu.dma_semaphore, #tpu.memory_space<semaphore_mem>>
      %73 = tpu.memref_squeeze %72 : memref<1x!tpu.dma_semaphore, #tpu.memory_space<semaphore_mem>> -> memref<!tpu.dma_semaphore, #tpu.memory_space<semaphore_mem>>
      tpu.wait_dma2 semaphore(%73 : memref<!tpu.dma_semaphore, #tpu.memory_space<semaphore_mem>>) src(%arg6 : memref<128x256xbf16, #tpu.memory_space<any>>) dst(%arg11 : memref<128x256xbf16, #tpu.memory_space<vmem>>)
      %74 = arith.truncf %71 : vector<8x128xf32> to vector<8x128xbf16>
      %c0_38 = arith.constant 0 : index
      %c0_39 = arith.constant 0 : index
      %75 = vector.load %arg11[%c0_38, %c0_39] : memref<128x256xbf16, #tpu.memory_space<vmem>>, vector<128x256xbf16>
      %cst_40 = arith.constant dense<0.000000e+00> : vector<8x256xf32>
      %76 = tpu.matmul %74, %75, %cst_40 {dimension_numbers = #tpu.dot_dimension_numbers<[1], [0], [0], [1], [0, 0, 1, 1], [], []>} : vector<8x128xbf16>, vector<128x256xbf16>, vector<8x256xf32> -> vector<8x256xf32>
      %c0_41 = arith.constant 0 : index
      %c0_42 = arith.constant 0 : index
      %77 = vector.load %arg7[%c0_41, %c0_42] : memref<1x256xf32, #tpu.memory_space<vmem>>, vector<1x256xf32>
      %78 = vector.broadcast %77 : vector<1x256xf32> to vector<8x256xf32>
      %79 = arith.addf %76, %78 : vector<8x256xf32>
      %c0_43 = arith.constant 0 : index
      %c0_44 = arith.constant 0 : index
      %80 = vector.load %arg8[%c0_43, %c0_44] : memref<8x256xf32, #tpu.memory_space<vmem>>, vector<8x256xf32>
      tpu.vector_store %arg8[%c0_43, %c0_44], %79 {strides = array<i32>} : memref<8x256xf32, #tpu.memory_space<vmem>>, vector<8x256xf32>,
    } else {
    }
    return
  }
  func.func @transform_0(%arg0: i32) -> (i32, i32) {
    %c0_i32 = arith.constant 0 : i32
    %c0_i32_0 = arith.constant 0 : i32
    return %c0_i32, %arg0 : i32, i32
  }
  func.func @transform_1(%arg0: i32) -> (i32, i32) {
    %c0_i32 = arith.constant 0 : i32
    %c0_i32_0 = arith.constant 0 : i32
    return %arg0, %c0_i32 : i32, i32
  }
  func.func @transform_2(%arg0: i32) -> (i32, i32) {
    %c0_i32 = arith.constant 0 : i32
    %c0_i32_0 = arith.constant 0 : i32
    %c0_i32_1 = arith.constant 0 : i32
    return %c0_i32, %c0_i32_0 : i32, i32
  }
  func.func @transform_4(%arg0: i32) -> (i32, i32) {
    %c0_i32 = arith.constant 0 : i32
    %c0_i32_0 = arith.constant 0 : i32
    %c0_i32_1 = arith.constant 0 : i32
    return %c0_i32, %c0_i32_0 : i32, i32
  }
  func.func @transform_6(%arg0: i32) -> (i32, i32) {
    %c0_i32 = arith.constant 0 : i32
    %c0_i32_0 = arith.constant 0 : i32
    %c0_i32_1 = arith.constant 0 : i32
    return %c0_i32, %c0_i32_0 : i32, i32
  }
  func.func @transform_7(%arg0: i32) -> (i32, i32) {
    %c0_i32 = arith.constant 0 : i32
    %c0_i32_0 = arith.constant 0 : i32
    %c0_i32_1 = arith.constant 0 : i32
    return %c0_i32, %c0_i32_0 : i32, i32
  }
}

</mosaic_0001>

<bundles_post_ra>
// kernel: tpu_custom_call.1
= control target key start
LH: loop header
LB: loop body
LE: loop exit
PB: predicated region body
PF: predicated region fallthrough
CT: control target
= control target key end

     0   :  { %12 = vsyncpa [#allocation7], 0  ;;  %s963_s0 = inlined_call_operand.hbm [shape: bf16[8,128], index: 0, kind: input, shape index: {}]   ;;  %s964_s1 = inlined_call_operand.hbm [shape: bf16[128,128], index: 1, kind: input, shape index: {}]   ;;  %s965_s2 = inlined_call_operand.hbm [shape: f32[3,128], index: 2, kind: input, shape index: {}]   ;;  %s966_s3 = inlined_call_operand.hbm [shape: bf16[128,128], index: 3, kind: input, shape index: {}]   ;;  %s967_s4 = inlined_call_operand.vmem [shape: f32[3,128], index: 4, kind: input, shape index: {}]   ;;  %s968_s5 = inlined_call_operand.hbm [shape: bf16[128,256], index: 5, kind: input, shape index: {}]   ;;  %s969_s6 = inlined_call_operand.vmem [shape: f32[1,256], index: 6, kind: input, shape index: {}]   ;;  %s970_s7 = inlined_call_operand.hbm [shape: f32[8,256], index: 7, kind: output, shape index: {}]  }
   0x1   :  { %13 = vsyncpa [#allocation10], 0 }
   0x2   :  { %14 = vsyncpa [#allocation8], 0  ;;  %s853_s24 = smov [#allocation9]  }
   0x3   :  { %s30_s25 = sshll.u32 %s853_s24, 4  ;;  %s31_s25 = int_to_ptr.vmem [resolvable:$true] %s30_s25 }
   0x4   :  { %s731_s26 = scalar_lea.vmem %s31_s25, 1024  ;;  %p736_p1 = scmp.lt.s32.totalorder %s31_s25, %s31_s25 }
   0x5   :  { %p732_p0 = scmp.ne.s32.totalorder %s31_s25, %s731_s26  ;;  %p737_p2 = scmp.lt.s32.totalorder %s731_s26, %s731_s26 }
   0x7   :  { %p738_p3 = por %p737_p2, %p736_p1 }
   0x9   :  { %p739_p4 = pnand %p738_p3, %p732_p0 }
   0xb   :  { %742 = shalt.err (!%p739_p4)
}
   0xc   :  { %s854_s27 = smov 64   ;;  %s855_s28 = smov 4  }
   0xd   :  { %36 = dma.hbm_to_vmem [thread:$0]  %s964_s1, 1024, %s31_s25, [#allocation10], %s854_s27, %s854_s27, %s855_s28  }
   0xe   :  { %s856_s8 = smov [#allocation6]   ;;  %s857_s10 = smov [#allocation11]  }
   0xf   :  { %s21_s9 = sshll.u32 %s856_s8, 4  ;;  %s43_s11 = sshll.u32 %s857_s10, 4  ;;  %s22_s9 = int_to_ptr.vmem [resolvable:$true] %s21_s9  ;;  %s44_s11 = int_to_ptr.vmem [resolvable:$true] %s43_s11 }
  0x10   :  { %s751_s12 = scalar_lea.vmem %s22_s9, 64  ;;  %p756_p6 = scmp.lt.s32.totalorder %s22_s9, %s22_s9 }
  0x11   :  { %p752_p5 = scmp.ne.s32.totalorder %s22_s9, %s751_s12  ;;  %p757_p7 = scmp.lt.s32.totalorder %s751_s12, %s751_s12 }
  0x13   :  { %p758_p8 = por %p757_p7, %p756_p6 }
  0x15   :  { %p759_p9 = pnand %p758_p8, %p752_p5 }
  0x17   :  { %762 = shalt.err (!%p759_p9)
}
  0x18   :  { %24 = dma.hbm_to_vmem [thread:$0]  %s963_s0, 64, %s22_s9, [#allocation7]  }
  0x19   :  { %s771_s15 = scalar_lea.vmem %s44_s11, 64  ;;  %p776_p11 = scmp.lt.s32.totalorder %s44_s11, %s44_s11 }
  0x1a   :  { %p772_p10 = scmp.ne.s32.totalorder %s44_s11, %s771_s15  ;;  %p777_p12 = scmp.lt.s32.totalorder %s771_s15, %s771_s15 }
  0x1c   :  { %p778_p13 = por %p777_p12, %p776_p11 }
  0x1e   :  { %p779_p0 = pnand %p778_p13, %p772_p10 }
  0x20   :  { %782 = shalt.err (!%p779_p0)
}
  0x21   :  { %46 = dma.hbm_to_vmem [thread:$0]  %s965_s2, 64, %s44_s11, [#allocation10]  }
  0x22   :  { %843 = dma.done.wait [#allocation7], 64  }
  0x23   :  { %844 = vsyncadd [#allocation7], 4294967232 }
  0x24   :  { %845 = dma.done.wait [#allocation10], 1088  }
  0x25   :  { %846 = vsyncadd [#allocation10], 4294966208  ;;  %v858_v0 = vmov 0.0   ;;  %vm859_vm0 = vmmov 0   ;;  %v679_v1 = vld [vmem:[#allocation9 + $0x38] sm:$0xff]   ;;  %v680_v2 = vld [vmem:[#allocation9 + $0x30] sm:$0xff]  }
  0x26   :  { %628 = vmatprep.subr.bf16.mxu0 %v858_v0  ;;  %644 = vmatprep.mubr.msk.bf16.mxu0 %vm859_vm0, %v858_v0  ;;  %v681_v3 = vld [vmem:[#allocation9 + $0x28] sm:$0xff]   ;;  %v682_v4 = vld [vmem:[#allocation9 + $0x20] sm:$0xff]   ;;  %v683_v5 = vld [vmem:[#allocation9 + $0x18] sm:$0xff]   ;;  %s860_s0 = smov [#allocation3]   ;;  %s861_s17 = smov [#allocation4]  }
  0x27   :  { %629 = vmatpush3.bf16.msra.mxu0 %v679_v1  ;;  %v684_v6 = vld [vmem:[#allocation9 + $0x10] sm:$0xff]   ;;  %v685_v7 = vld [vmem:[#allocation9 + $0x8] sm:$0xff]   ;;  %v686_v8 = vld [vmem:[#allocation9] sm:$0xff]   ;;  %s73_s2 = sshll.u32 %s860_s0, 4  ;;  %s85_s18 = sshll.u32 %s861_s17, 4  ;;  %s74_s2 = int_to_ptr.vmem [resolvable:$true] %s73_s2  ;;  %s86_s18 = int_to_ptr.vmem [resolvable:$true] %s85_s18 }
  0x28   :  { %630 = vmatprep.subr.bf16.mxu0 %v858_v0  ;;  %v90_v9 = vld [vmem:[#allocation6] sm:$0xf]  ;;  %s791_s19 = scalar_lea.vmem %s74_s2, 1024  ;;  %p796_p2 = scmp.lt.s32.totalorder %s74_s2, %s74_s2 }
  0x29   :  { %p792_p1 = scmp.ne.s32.totalorder %s74_s2, %s791_s19  ;;  %p797_p3 = scmp.lt.s32.totalorder %s791_s19, %s791_s19 }
  0x2b   :  { %631 = vmatpush3.bf16.msra.mxu0 %v680_v2  ;;  %p798_p4 = por %p797_p3, %p796_p2 }
  0x2c   :  { %632 = vmatprep.subr.bf16.mxu0 %v858_v0 }
  0x2d   :  { %p799_p5 = pnand %p798_p4, %p792_p1 }
  0x2f   :  { %633 = vmatpush3.bf16.msra.mxu0 %v681_v3 }
  0x30   :  { %634 = vmatprep.subr.bf16.mxu0 %v858_v0 }
  0x33   :  { %635 = vmatpush3.bf16.msra.mxu0 %v682_v4 }
  0x34   :  { %636 = vmatprep.subr.bf16.mxu0 %v858_v0 }
  0x37   :  { %637 = vmatpush3.bf16.msra.mxu0 %v683_v5 }
  0x38   :  { %638 = vmatprep.subr.bf16.mxu0 %v858_v0 }
  0x3b   :  { %639 = vmatpush3.bf16.msra.mxu0 %v684_v6 }
  0x3c   :  { %640 = vmatprep.subr.bf16.mxu0 %v858_v0 }
  0x3f   :  { %641 = vmatpush3.bf16.msra.mxu0 %v685_v7 }
  0x40   :  { %642 = vmatprep.subr.bf16.mxu0 %v858_v0 }
  0x43   :  { %643 = vmatpush3.bf16.msra.mxu0 %v686_v8 }
  0x46   :  { %645 = vmatmul.mubr.bf16.vlgmr.msra.gmra.mxu0 %v90_v9 }
  0x47   :  { %802 = shalt.err (!%p799_p5)  }
  0x48   :  { %76 = dma.hbm_to_vmem [thread:$0]  %s966_s3, 1024, %s74_s2, [#allocation5] }
  0x49   :  { %s811_s22 = scalar_lea.vmem %s86_s18, 2048  ;;  %p816_p7 = scmp.lt.s32.totalorder %s86_s18, %s86_s18 }
  0x4a   :  { %p812_p6 = scmp.ne.s32.totalorder %s86_s18, %s811_s22  ;;  %p817_p8 = scmp.lt.s32.totalorder %s811_s22, %s811_s22 }
  0x4c   :  { %p818_p9 = por %p817_p8, %p816_p7 }
  0x4e   :  { %p819_p10 = pnand %p818_p9, %p812_p6 }
  0x50   :  { %822 = shalt.err (!%p819_p10)  }
  0x51   :  { %88 = dma.hbm_to_vmem [thread:$0]  %s968_s5, 2048, %s86_s18, [#allocation5 + $0x1]  ;;  %v580_v10 = vld [vmem:[#allocation11] ss:$0 sm:$0xff]  ;;  %v230_v35 = vlaneseq  ;;  %v202_v37 = vld [vmem:[#allocation11 + $0x1] sm:$0x1] }
  0x52   :  { %v581_v42 = vld [vmem:[#allocation11 + $0x2] ss:$0 sm:$0xff] }
  0x53   :  { %v929_v36 = vshrl.u32 %v230_v35, 7 }
  0x55   :  { %v932_v38 = vsub.s32 0, %v929_v36 }
 0x106   :  { %v189_v11 = vpop.f32.mrf.mxu0 }
 0x107   :  { %v208_v12 = vadd.f32 %v580_v10, %v189_v11 }
 0x108   :  { %v646_v13 = vpop.f32.mrf.mxu0 }
 0x109   :  { %v209_v14 = vmul.f32 0.2, %v208_v12 }
 0x10a   :  { %v192_v15 = vpop.f32.mrf.mxu0 }
 0x10b   :  { %v210_v16 = vmax.f32 %v208_v12, %v209_v14 }
 0x10c   :  { %v647_v17 = vpop.f32.mrf.mxu0 }
 0x10d   :  { %v211_v18 = vrot.slane %v210_v16, 4 }
 0x10f   :  { %v212_v19 = vadd.f32 %v211_v18, %v210_v16 }
 0x111   :  { %v213_v20 = vrot.slane %v212_v19, 2 }
 0x113   :  { %v214_v21 = vadd.f32 %v213_v20, %v212_v19 }
 0x115   :  { %v215_v22 = vrot.slane %v214_v21, 1 }
 0x117   :  { %v216_v23 = vadd.f32 %v215_v22, %v214_v21 }
 0x119   :  { %v217_v24 = vmul.f32 0.125, %v216_v23 }
 0x11b   :  { %v218_v25 = vsub.f32 %v210_v16, %v217_v24 }
 0x11d   :  { %v219_v26 = vmul.f32 %v218_v25, %v218_v25 }
 0x11f   :  { %v220_v27 = vrot.slane %v219_v26, 4 }
 0x121   :  { %v221_v28 = vadd.f32 %v220_v27, %v219_v26 }
 0x123   :  { %v222_v29 = vrot.slane %v221_v28, 2 }
 0x125   :  { %v223_v30 = vadd.f32 %v222_v29, %v221_v28 }
 0x127   :  { %v224_v31 = vrot.slane %v223_v30, 1 }
 0x129   :  { %v225_v32 = vadd.f32 %v224_v31, %v223_v30 }
 0x12b   :  { %v226_v33 = vmul.f32 0.125, %v225_v32 }
 0x12d   :  { %v227_v34 = vadd.f32 1e-05, %v226_v33 }
 0x12f   :  { %687 = vrsqrt.f32 %v227_v34 }
 0x13c   :  { %v688_v39 = vpop.eup %687 }
 0x13d   :  { %v229_v40 = vmul.f32 %v688_v39, %v202_v37 }
 0x13f   :  { %v233_v41 = vrot.slane %v229_v40, %v932_v38 }
 0x141   :  { %v234_v43 = vmul.f32 %v233_v41, %v218_v25 }
 0x143   :  { %v239_v44 = vadd.f32 %v581_v42, %v234_v43 }
 0x144   :  { %847 = dma.done.wait [#allocation5], 1024 }
 0x145   :  { %848 = vsyncadd [#allocation5], 4294966272  ;;  %648 = vmatprep.subr.bf16.mxu1 %v858_v0  ;;  %664 = vmatprep.mubr.msk.bf16.mxu1 %vm859_vm0, %v858_v0  ;;  %v689_v45 = vld [vmem:[#allocation3 + $0x38] sm:$0xff]   ;;  %v690_v46 = vld [vmem:[#allocation3 + $0x30] sm:$0xff]   ;;  %v244_v53 = vpack.c.bf16 %v239_v44, %v239_v44 }
 0x146   :  { %649 = vmatpush3.bf16.msra.mxu1 %v689_v45  ;;  %v691_v47 = vld [vmem:[#allocation3 + $0x28] sm:$0xff]   ;;  %v692_v48 = vld [vmem:[#allocation3 + $0x20] sm:$0xff]   ;;  %v693_v49 = vld [vmem:[#allocation3 + $0x18] sm:$0xff]  }
 0x147   :  { %650 = vmatprep.subr.bf16.mxu1 %v858_v0  ;;  %v694_v50 = vld [vmem:[#allocation3 + $0x10] sm:$0xff]   ;;  %v695_v51 = vld [vmem:[#allocation3 + $0x8] sm:$0xff]   ;;  %v696_v52 = vld [vmem:[#allocation3] sm:$0xff]  }
 0x148   :  { %v582_v54 = vld [vmem:[%s967_s4] ss:$0 sm:$0xff]  ;;  %v262_v15 = vld [vmem:[%s967_s4 + $0x1] sm:$0x1]  ;;  %v591_v19 = vld [vmem:[%s967_s4 + $0x2] ss:$0 sm:$0xff] }
 0x14a   :  { %651 = vmatpush3.bf16.msra.mxu1 %v690_v46 }
 0x14b   :  { %652 = vmatprep.subr.bf16.mxu1 %v858_v0 }
 0x14e   :  { %653 = vmatpush3.bf16.msra.mxu1 %v691_v47 }
 0x14f   :  { %654 = vmatprep.subr.bf16.mxu1 %v858_v0 }
 0x152   :  { %655 = vmatpush3.bf16.msra.mxu1 %v692_v48 }
 0x153   :  { %656 = vmatprep.subr.bf16.mxu1 %v858_v0 }
 0x156   :  { %657 = vmatpush3.bf16.msra.mxu1 %v693_v49 }
 0x157   :  { %658 = vmatprep.subr.bf16.mxu1 %v858_v0 }
 0x15a   :  { %659 = vmatpush3.bf16.msra.mxu1 %v694_v50 }
 0x15b   :  { %660 = vmatprep.subr.bf16.mxu1 %v858_v0 }
 0x15e   :  { %661 = vmatpush3.bf16.msra.mxu1 %v695_v51 }
 0x15f   :  { %662 = vmatprep.subr.bf16.mxu1 %v858_v0 }
 0x162   :  { %663 = vmatpush3.bf16.msra.mxu1 %v696_v52 }
 0x165   :  { %665 = vmatmul.mubr.bf16.vlgmr.msra.gmra.mxu1 %v244_v53 }
 0x225   :  { %v350_v55 = vpop.f32.mrf.mxu1 }
 0x226   :  { %v351_v56 = vadd.f32 %v582_v54, %v350_v55 }
 0x227   :  { %v666_v57 = vpop.f32.mrf.mxu1 }
 0x228   :  { %v356_v58 = vmul.f32 0.2, %v351_v56 }
 0x229   :  { %v353_v59 = vpop.f32.mrf.mxu1 }
 0x22a   :  { %v357_v60 = vmax.f32 %v351_v56, %v356_v58 }
 0x22b   :  { %v667_v61 = vpop.f32.mrf.mxu1 }
 0x22c   :  { %v358_v62 = vrot.slane %v357_v60, 4 }
 0x22e   :  { %v359_v63 = vadd.f32 %v358_v62, %v357_v60 }
 0x230   :  { %v360_v1 = vrot.slane %v359_v63, 2 }
 0x232   :  { %v361_v2 = vadd.f32 %v360_v1, %v359_v63 }
 0x234   :  { %v362_v3 = vrot.slane %v361_v2, 1 }
 0x236   :  { %v363_v0 = vadd.f32 %v362_v3, %v361_v2 }
 0x238   :  { %v364_v4 = vmul.f32 0.125, %v363_v0 }
 0x23a   :  { %v365_v5 = vsub.f32 %v357_v60, %v364_v4 }
 0x23c   :  { %v366_v6 = vmul.f32 %v365_v5, %v365_v5 }
 0x23e   :  { %v367_v7 = vrot.slane %v366_v6, 4 }
 0x240   :  { %v368_v8 = vadd.f32 %v367_v7, %v366_v6 }
 0x242   :  { %v369_v9 = vrot.slane %v368_v8, 2 }
 0x244   :  { %v370_v10 = vadd.f32 %v369_v9, %v368_v8 }
 0x246   :  { %v371_v11 = vrot.slane %v370_v10, 1 }
 0x248   :  { %v372_v12 = vadd.f32 %v371_v11, %v370_v10 }
 0x24a   :  { %v373_v13 = vmul.f32 0.125, %v372_v12 }
 0x24c   :  { %v374_v14 = vadd.f32 1e-05, %v373_v13 }
 0x24e   :  { %697 = vrsqrt.f32 %v374_v14 }
 0x25b   :  { %v698_v16 = vpop.eup %697 }
 0x25c   :  { %v376_v17 = vmul.f32 %v698_v16, %v262_v15 }
 0x25e   :  { %v380_v18 = vrot.slane %v376_v17, %v932_v38 }
 0x260   :  { %v381_v20 = vmul.f32 %v380_v18, %v365_v5 }
 0x262   :  { %v386_v21 = vadd.f32 %v591_v19, %v381_v20 }
 0x263   :  { %849 = dma.done.wait [#allocation5 + $0x1], 2048 }
 0x264   :  { %850 = vsyncadd [#allocation5 + $0x1], 4294965248  ;;  %v862_v22 = vmov 0   ;;  %v699_v23 = vld [vmem:[#allocation4 + $0x74] ss:$8 sps:$4 sm:$0xff]   ;;  %v391_v41 = vpack.c.bf16 %v386_v21, %v386_v21  ;;  %v416_v43 = vsub.s32 1, %v929_v36 }
 0x265   :  { %532 = vmatprep.mubr.bf16.mxu0 %v862_v22  ;;  %v701_v24 = vld [vmem:[#allocation4 + $0x70] ss:$8 sps:$4 sm:$0xff]   ;;  %500 = vmatprep.subr.bf16.mxu0 %v699_v23  ;;  %v702_v25 = vld [vmem:[#allocation4 + $0x64] ss:$8 sps:$4 sm:$0xff]   ;;  %v704_v26 = vld [vmem:[#allocation4 + $0x60] ss:$8 sps:$4 sm:$0xff]  }
 0x266   :  { %501 = vmatpush1.bf16.msra.mxu0 %v701_v24  ;;  %v705_v27 = vld [vmem:[#allocation4 + $0x54] ss:$8 sps:$4 sm:$0xff]   ;;  %v707_v28 = vld [vmem:[#allocation4 + $0x50] ss:$8 sps:$4 sm:$0xff]   ;;  %v708_v29 = vld [vmem:[#allocation4 + $0x44] ss:$8 sps:$4 sm:$0xff]  }
 0x267   :  { %502 = vmatprep.subr.bf16.mxu0 %v702_v25  ;;  %v710_v30 = vld [vmem:[#allocation4 + $0x40] ss:$8 sps:$4 sm:$0xff]   ;;  %v711_v31 = vld [vmem:[#allocation4 + $0x34] ss:$8 sps:$4 sm:$0xff]   ;;  %v713_v32 = vld [vmem:[#allocation4 + $0x30] ss:$8 sps:$4 sm:$0xff]  }
 0x268   :  { %v714_v33 = vld [vmem:[#allocation4 + $0x24] ss:$8 sps:$4 sm:$0xff]   ;;  %v716_v34 = vld [vmem:[#allocation4 + $0x20] ss:$8 sps:$4 sm:$0xff]   ;;  %v717_v35 = vld [vmem:[#allocation4 + $0x14] ss:$8 sps:$4 sm:$0xff]  }
 0x269   :  { %v719_v37 = vld [vmem:[#allocation4 + $0x10] ss:$8 sps:$4 sm:$0xff]   ;;  %v720_v39 = vld [vmem:[#allocation4 + $0x4] ss:$8 sps:$4 sm:$0xff]   ;;  %v722_v40 = vld [vmem:[#allocation4] ss:$8 sps:$4 sm:$0xff]  }
 0x26a   :  { %503 = vmatpush1.bf16.msra.mxu0 %v704_v26  ;;  %v408_v42 = vld [vmem:[%s969_s6] sm:$0x3]  ;;  %s863_s30 = smov [#allocation12]  }
 0x26b   :  { %504 = vmatprep.subr.bf16.mxu0 %v705_v27  ;;  %v413_v44 = vrot.slane %v408_v42, %v932_v38  ;;  %v417_v45 = vrot.slane %v408_v42, %v416_v43  ;;  %s549_s8 = sshll.u32 %s863_s30, 4  ;;  %s550_s8 = int_to_ptr.vmem [resolvable:$true] %s549_s8 }
 0x26c   :  { %s823_s9 = scalar_lea.vmem %s550_s8, 256  ;;  %p828_p12 = scmp.lt.s32.totalorder %s550_s8, %s550_s8 }
 0x26d   :  { %p824_p11 = scmp.ne.s32.totalorder %s550_s8, %s823_s9  ;;  %p829_p13 = scmp.lt.s32.totalorder %s823_s9, %s823_s9 }
 0x26e   :  { %505 = vmatpush1.bf16.msra.mxu0 %v707_v28 }
 0x26f   :  { %506 = vmatprep.subr.bf16.mxu0 %v708_v29  ;;  %p830_p0 = por %p829_p13, %p828_p12 }
 0x271   :  { %p831_p1 = pnand %p830_p0, %p824_p11 }
 0x272   :  { %507 = vmatpush1.bf16.msra.mxu0 %v710_v30 }
 0x273   :  { %508 = vmatprep.subr.bf16.mxu0 %v711_v31 }
 0x276   :  { %509 = vmatpush1.bf16.msra.mxu0 %v713_v32 }
 0x277   :  { %510 = vmatprep.subr.bf16.mxu0 %v714_v33 }
 0x27a   :  { %511 = vmatpush1.bf16.msra.mxu0 %v716_v34 }
 0x27b   :  { %512 = vmatprep.subr.bf16.mxu0 %v717_v35 }
 0x27e   :  { %513 = vmatpush1.bf16.msra.mxu0 %v719_v37 }
 0x27f   :  { %514 = vmatprep.subr.bf16.mxu0 %v720_v39 }
 0x282   :  { %515 = vmatpush1.bf16.msra.mxu0 %v722_v40 }
 0x285   :  { %533 = vmatmul.mubr.bf16.vlgmr.msra.gmra.mxu0 %v391_v41 }
 0x345   :  { %v534_v46 = vpop.f32.mrf.mxu0 }
 0x346   :  { %v535_v47 = vadd.f32 %v534_v46, %v413_v44 }
 0x347   :  { %v536_v48 = vpop.f32.mrf.mxu0 }
 0x348   :  { %541 = vst [vmem:[#allocation12] sm:$0xff] %v535_v47  ;;  %v537_v49 = vadd.f32 %v536_v48, %v417_v45 }
 0x349   :  { %v538_v50 = vpop.f32.mrf.mxu0 }
 0x34a   :  { %542 = vst [vmem:[#allocation12 + $0x8] sm:$0xff] %v537_v49 }
 0x34b   :  { %v539_v51 = vpop.f32.mrf.mxu0 }
 0x34c   :  { %834 = shalt.err (!%p831_p1)
}
 0x34d   :  { %552 = dma.vmem_to_hbm [thread:$0]  %s550_s8, 256, %s970_s7, [#allocation8]  }
 0x34e   :  { %851 = dma.done.wait [#allocation8], 256  }
 0x34f   :  { %852 = vsyncadd [#allocation8], 4294967040 }
 0x350   :  { %556 = vsyncpa [#allocation7], 1 }
 0x351   :  { %557 = vsyncpa [#allocation10], 1 }
 0x352   :  { %558 = vsyncpa [#allocation8], 1 }
 0x353   :  { %559 = vsyncmov [#allocation5] }
 0x356   :  { %s560_s11 = vpop.sfrf %559 }
 0x357   :  { %p608_p2 = scmp.ne.s32.totalorder %s560_s11, 0 }
 0x359   :  { %564 = shalt.err (%p608_p2)  }
 0x35a   :  { %566 = vsyncmov [#allocation5 + $0x1] }
 0x35d   :  { %s567_s12 = vpop.sfrf %566 }
 0x35e   :  { %p609_p3 = scmp.ne.s32.totalorder %s567_s12, 0 }
 0x360   :  { %571 = shalt.err (%p609_p3)  }

</bundles_post_ra>
